<compile_context>
chip_gen: v7x
topology: tpu7x:2x2x1
jax: 0.10.0
libtpu: 0.0.40
codegen_flags: <defaults>
</compile_context>

<pallas_src>
import functools

import jax
import jax.numpy as jnp
from jax import lax
from jax.experimental import pallas as pl
from jax.experimental.pallas import tpu as pltpu

NUM_CLASSES_FULL = 200  # loss_weight normalizes by torch.log2(torch.tensor(200))
LANE = 128


def _round_up(v, m):
    return (v + m - 1) // m * m


def _pick_tk(d_pad, tk_target):
    """Largest multiple of LANE <= tk_target that divides d_pad (d_pad % 128 == 0)."""
    tk_target = max(LANE, min(int(tk_target), d_pad))
    tk_target = (tk_target // LANE) * LANE
    for t in range(tk_target, LANE - 1, -LANE):
        if d_pad % t == 0:
            return t
    return LANE


# ---------------------------------------------------------------------------
# Fused kernel:
#   grid = (d_pad // tk,)  -- K (reduction) axis, "arbitrary"
#   acc (B, pack_n) f32 VMEM scratch accumulates  x_bf16 @ W_sel_bf16  over K,
#   where W_sel packs the 3*Kc pre-selected class columns [stu | ema | anchor]
#   into one lane-dense slab (pack_n = round_up(3*Kc, 128)).
#   On the last K step (class mask folded in as a per-lane scale):
#     logits = (acc + b) * mask                 -> stored lane-dense (B, pack_n)
#     per-sample stats packed into one (B, 128) slab:
#       col 0: w       = loss_weight(outputs_ema)
#       col 1: ce      = softmax_entropy_cifar(out, out_ema)
#       col 2: div     = softmax_entropy(out)
#       col 3: ent_t   = softmax_entropy(out_ema)
#       col 4: anc_max = softmax(anchor).max(1)
# ---------------------------------------------------------------------------
def _fused_tta_kernel(x_ref, w_ref, b_ref, mk_ref, logits_ref, stats_ref,
                      acc_ref, *, kc, pack_n, batch):
    k = pl.program_id(0)

    @pl.when(k == 0)
    def _():
        acc_ref[...] = jnp.zeros_like(acc_ref)

    acc_ref[...] += jnp.dot(x_ref[...], w_ref[...],
                            preferred_element_type=jnp.float32)

    # Epilogue fused on the last K step only.  Correct because the K axis is
    # "arbitrary" and the output block index is constant across it (do NOT mark
    # this axis "parallel").
    @pl.when(k == pl.num_programs(0) - 1)
    def _():
        # Class mask commutes through the matmul: mask_j * (x.W_j + b_j).
        logits = (acc_ref[...] + b_ref[...]) * mk_ref[...]      # (B, pack_n) f32
        logits_ref[...] = logits     # lane-dense packed [stu | ema | anchor | 0]

        col = lax.broadcasted_iota(jnp.int32, (batch, pack_n), 1)
        neg = jnp.float32(-1e30)

        def head_softmax(lo):
            in_head = (col >= lo) & (col < lo + kc)
            zm = jnp.where(in_head, logits, neg)
            mx = jnp.max(zm, axis=1, keepdims=True)
            zs = zm - mx
            e = jnp.exp(zs)                       # exactly 0 outside the head
            ssum = jnp.sum(e, axis=1, keepdims=True)
            p = e / ssum                          # exact (feeds loss_weight)
            lsm = jnp.where(in_head, zs - jnp.log(ssum), 0.0)
            return p, lsm

        p_stu, lsm_stu = head_softmax(0)
        p_ema, lsm_ema = head_softmax(kc)
        p_anc, _ = head_softmax(2 * kc)

        # Align EMA probs (lanes [kc, 2kc)) onto student lanes [0, kc) with a
        # tiny in-register shift matmul (no ragged lane gather needed).
        r = lax.broadcasted_iota(jnp.int32, (pack_n, pack_n), 0)
        c = lax.broadcasted_iota(jnp.int32, (pack_n, pack_n), 1)
        shift_l = (r == c + kc).astype(jnp.float32)
        p_ema_s = jnp.dot(p_ema, shift_l, preferred_element_type=jnp.float32)

        inv_log2 = jnp.float32(1.0 / jnp.log(2.0))
        max_entropy = jnp.log(jnp.float32(NUM_CLASSES_FULL)) * inv_log2  # log2(200)

        # loss_weight(outputs_ema)
        ent_bits = -jnp.sum(p_ema * (jnp.log(p_ema + 1e-5) * inv_log2),
                            axis=1, keepdims=True)
        w = jnp.exp(-(ent_bits / max_entropy))
        # softmax_entropy_cifar(outputs, outputs_ema)
        ce = -jnp.sum(p_ema_s * lsm_stu, axis=1, keepdims=True)
        # softmax_entropy(outputs), temperature = 1
        div = -jnp.sum(p_stu * lsm_stu, axis=1, keepdims=True)
        # softmax_entropy(outputs_ema)  (teacher loss)
        ent_t = -jnp.sum(p_ema * lsm_ema, axis=1, keepdims=True)
        # anchor_prob = softmax(anchor).max(1)[0]
        anc_max = jnp.max(p_anc, axis=1, keepdims=True)

        # Pack the five per-sample columns into one lane-dense (B, 128) store.
        scol = lax.broadcasted_iota(jnp.int32, (batch, LANE), 1)
        zero = jnp.float32(0.0)
        stats_ref[...] = (jnp.where(scol == 0, w, zero) +
                          jnp.where(scol == 1, ce, zero) +
                          jnp.where(scol == 2, div, zero) +
                          jnp.where(scol == 3, ent_t, zero) +
                          jnp.where(scol == 4, anc_max, zero))


def fused_tta_forward(x_bf, w_sel, b_sel, mask_sel, *, tk, kc, pack_n):
    B, d_pad = x_bf.shape
    grid = (d_pad // tk,)
    kernel = functools.partial(_fused_tta_kernel, kc=kc, pack_n=pack_n, batch=B)
    cost = pl.CostEstimate(
        flops=2 * B * d_pad * pack_n,
        transcendentals=8 * B * pack_n,
        bytes_accessed=(d_pad * pack_n * 2          # bf16 packed selected W
                        + B * d_pad * 2             # bf16 x
                        + 2 * pack_n * 4            # bias + mask
                        + B * (pack_n + LANE) * 4)) # outputs
    return pl.pallas_call(
        kernel,
        out_shape=(jax.ShapeDtypeStruct((B, pack_n), jnp.float32),
                   jax.ShapeDtypeStruct((B, LANE), jnp.float32)),
        grid_spec=pltpu.PrefetchScalarGridSpec(
            num_scalar_prefetch=0,
            grid=grid,
            in_specs=[
                pl.BlockSpec((B, tk), lambda k: (0, k)),       # x tile (bf16)
                pl.BlockSpec((tk, pack_n), lambda k: (k, 0)),  # packed selected W (bf16)
                pl.BlockSpec((1, pack_n), lambda k: (0, 0)),   # selected bias (f32)
                pl.BlockSpec((1, pack_n), lambda k: (0, 0)),   # selected class mask (f32)
            ],
            out_specs=[
                pl.BlockSpec((B, pack_n), lambda k: (0, 0)),
                pl.BlockSpec((B, LANE), lambda k: (0, 0)),
            ],
            scratch_shapes=[pltpu.VMEM((B, pack_n), jnp.float32)],
        ),
        compiler_params=pltpu.CompilerParams(
            dimension_semantics=("arbitrary",),
            vmem_limit_bytes=32 * 1024 * 1024),
        cost_estimate=cost,
    )(x_bf, w_sel, b_sel, mask_sel)


# ---------------------------------------------------------------------------
# Forward wrapper reproducing Parallel_psedo_contrast.forward_and_adapt
# (inference/compute portion; returned value is `outputs`, as in the module).
# ---------------------------------------------------------------------------
def parallel_psedo_contrast_forward(params, x, epoch, it, class_mask,
                                    class_number, ap=0.92, tk=2048):
    B = x.shape[0]
    x2d = x.reshape(B, -1).astype(jnp.float32)
    D = x2d.shape[1]
    Kc = int(class_number.shape[0])
    pack_n = _round_up(3 * Kc, LANE)     # 48 selected cols -> one 128-lane slab
    d_pad = _round_up(D, LANE)           # pad D only to the next lane multiple
    tk = _pick_tk(d_pad, tk)

    cls = class_number.astype(jnp.int32)

    # TODO(synk): the three backbone calls (self.model / model_ema / model_anchor)
    # are opaque nn.Modules in the original code; modeled here as linear heads
    # over the flattened image.

    # Host prep touches only the 3*Kc selected columns (O(D*Kc), not O(D*N)).
    def g_w(k):
        return jnp.take(params[k].astype(jnp.float32), cls, axis=1)      # (D, Kc)

    def g_b(k):
        return jnp.take(params[k].reshape(-1).astype(jnp.float32), cls)  # (Kc,)

    w_sel = jnp.concatenate([g_w("w_student"), g_w("w_ema"), g_w("w_anchor")],
                            axis=1)                                      # (D, 3Kc)
    w_sel = jnp.pad(w_sel, ((0, d_pad - D), (0, pack_n - 3 * Kc))).astype(jnp.bfloat16)
    # TODO(synk): for repeated adaptation steps, cache w_sel and rebuild only when
    # the underlying weights / class_number change; optional int8 (v5e/v6e) or
    # fp8-e4m3 (v7x) weight quantization would further halve the weight stream.

    b_sel = jnp.concatenate([g_b("b_student"), g_b("b_ema"), g_b("b_anchor")])
    b_sel = jnp.pad(b_sel, (0, pack_n - 3 * Kc)).reshape(1, pack_n)

    m_one = jnp.take(class_mask.astype(jnp.float32), cls)                # (Kc,)
    mask_sel = jnp.pad(jnp.tile(m_one, 3), (0, pack_n - 3 * Kc)).reshape(1, pack_n)

    x_bf = jnp.pad(x2d, ((0, 0), (0, d_pad - D))).astype(jnp.bfloat16)

    logits, pstats = fused_tta_forward(x_bf, w_sel, b_sel, mask_sel,
                                       tk=tk, kc=Kc, pack_n=pack_n)

    outputs = logits[:, 0:Kc]                # student selected (masked) logits
    standard_ema = logits[:, Kc:2 * Kc]
    anchor = logits[:, 2 * Kc:3 * Kc]

    w = pstats[:, 0]
    ce = pstats[:, 1]
    div = pstats[:, 2]
    ent_t = pstats[:, 3]
    anc_max = pstats[:, 4]

    # TODO(synk): the to_aug == True augmentation branch (get_tta_transforms +
    # num_aug teacher passes) is an external image-augmentation pipeline; we take
    # the to_aug == False path where outputs_ema = standard_ema.
    outputs_ema = standard_ema
    to_aug = jnp.mean(anc_max) < ap          # anchor_prob.mean(0) < ap

    # save_refine_psedo_lable: epoch == 0 path -> mask of all True; pseudo labels
    # mapped back to GLOBAL class ids via class_number.
    predictions = jnp.take(cls, jnp.argmax(outputs_ema, axis=1))
    label_mask = jnp.ones((B,), dtype=jnp.float32)

    loss_ce = jnp.mean(label_mask * (w * ce))   # use_memory path
    loss_div = jnp.mean(div)
    student_loss = (loss_ce + loss_div) / 2.0
    teacher_loss = jnp.mean(ent_t)

    # TODO(synk): backward()/optimizer.step(), the SupConLoss contrastive loop,
    # pseudo-label-bank mutation and file logging are stateful host/training
    # logic with no Pallas forward equivalent.
    stats = dict(loss_ce=loss_ce, loss_div=loss_div, student_loss=student_loss,
                 teacher_loss=teacher_loss, to_aug=to_aug, w=w,
                 anchor_prob=anc_max, predictions=predictions,
                 standard_ema=standard_ema, anchor=anchor)
    return outputs, stats


# ---------------------------------------------------------------------------
# Plain-JAX reference (for numerical validation of the kernel)
# ---------------------------------------------------------------------------
def _ref_losses(stu, ema, anc):
    p_ema = jax.nn.softmax(ema, axis=1)
    lsm = jax.nn.log_softmax(stu, axis=1)
    p_stu = jax.nn.softmax(stu, axis=1)
    max_ent = jnp.log2(jnp.float32(NUM_CLASSES_FULL))
    w = jnp.exp(-(-jnp.sum(p_ema * jnp.log2(p_ema + 1e-5), axis=1) / max_ent))
    ce = -jnp.sum(p_ema * lsm, axis=1)
    div = -jnp.sum(p_stu * lsm, axis=1)
    ent_t = -jnp.sum(p_ema * jax.nn.log_softmax(ema, axis=1), axis=1)
    anc_max = jnp.max(jax.nn.softmax(anc, axis=1), axis=1)
    return w, ce, div, ent_t, anc_max


if __name__ == "__main__":
    key = jax.random.PRNGKey(0)
    B, C, H, W = 8, 3, 16, 16
    D = C * H * W
    N = NUM_CLASSES_FULL
    Kc = 16  # number of selected classes (len(class_number))

    ks = jax.random.split(key, 8)
    x = jax.random.normal(ks[0], (B, C, H, W), dtype=jnp.float32)
    params = {
        "w_student": jax.random.normal(ks[1], (D, N), dtype=jnp.float32) * 0.02,
        "b_student": jnp.zeros((1, N), dtype=jnp.float32),
        "w_ema":     jax.random.normal(ks[2], (D, N), dtype=jnp.float32) * 0.02,
        "b_ema":     jnp.zeros((1, N), dtype=jnp.float32),
        "w_anchor":  jax.random.normal(ks[3], (D, N), dtype=jnp.float32) * 0.02,
        "b_anchor":  jnp.zeros((1, N), dtype=jnp.float32),
    }
    class_mask = jnp.where(jnp.arange(N) < 100, 1.0, 0.0).astype(jnp.float32)
    # straddle the mask boundary so the mask path is exercised
    class_number = jnp.arange(90, 90 + 2 * Kc, 2, dtype=jnp.int32)

    outputs, stats = parallel_psedo_contrast_forward(
        params, x, epoch=0, it=0, class_mask=class_mask,
        class_number=class_number, tk=256)   # tk=256 -> 3 K-steps on this demo
    outputs = jax.block_until_ready(outputs)

    # --- validate against a plain-JAX reference (bf16 weights, f32 accumulate) ---
    x2d = x.reshape(B, -1)
    msel = jnp.take(class_mask, class_number)[None, :]

    def ref_head(wk, bk):
        w_g = jnp.take(params[wk], class_number, axis=1).astype(jnp.bfloat16)
        lg = jnp.dot(x2d.astype(jnp.bfloat16), w_g,
                     preferred_element_type=jnp.float32)
        lg = lg + jnp.take(params[bk].reshape(-1), class_number)[None, :]
        return lg * msel

    ref_stu = ref_head("w_student", "b_student")
    ref_ema = ref_head("w_ema", "b_ema")
    ref_anc = ref_head("w_anchor", "b_anchor")

    assert jnp.allclose(outputs, ref_stu, atol=2e-3, rtol=2e-3)
    assert jnp.allclose(stats["standard_ema"], ref_ema, atol=2e-3, rtol=2e-3)
    assert jnp.allclose(stats["anchor"], ref_anc, atol=2e-3, rtol=2e-3)

    w_r, ce_r, div_r, ent_t_r, anc_r = _ref_losses(ref_stu, ref_ema, ref_anc)
    loss_ce_r = jnp.mean(w_r * ce_r)
    loss_div_r = jnp.mean(div_r)
    tol = dict(atol=5e-3, rtol=5e-3)
    assert jnp.allclose(stats["w"], w_r, **tol)
    assert jnp.allclose(stats["anchor_prob"], anc_r, **tol)
    assert jnp.allclose(stats["loss_ce"], loss_ce_r, **tol)
    assert jnp.allclose(stats["loss_div"], loss_div_r, **tol)
    assert jnp.allclose(stats["teacher_loss"], jnp.mean(ent_t_r), **tol)
    assert jnp.allclose(stats["student_loss"], (loss_ce_r + loss_div_r) / 2.0, **tol)
    ref_pred = jnp.take(class_number, jnp.argmax(ref_ema, axis=1))
    assert jnp.array_equal(stats["predictions"], ref_pred)

    print("KERNEL_OK")
</pallas_src>

<mosaic_0001>
module attributes {stable_mosaic.version = 11 : i64} {
  func.func @_fused_tta_kernel(%arg0: i32, %arg1: memref<8x256xbf16, #tpu.memory_space<vmem>>, %arg2: memref<256x128xbf16, #tpu.memory_space<vmem>>, %arg3: memref<1x128xf32, #tpu.memory_space<vmem>>, %arg4: memref<1x128xf32, #tpu.memory_space<vmem>>, %arg5: memref<8x128xf32, #tpu.memory_space<vmem>>, %arg6: memref<8x128xf32, #tpu.memory_space<vmem>>, %arg7: memref<8x128xf32, #tpu.memory_space<vmem>>) attributes {dimension_semantics = [#tpu.dimension_semantics<arbitrary>], iteration_bounds = array<i64: 3>, scalar_prefetch = 0 : i64, scratch_operands = 1 : i64, tpu.core_type = #tpu.core_type<tc>, window_params = [{transform_indices = @transform_0, window_bounds = array<i64: 8, 256>}, {transform_indices = @transform_1, window_bounds = array<i64: 256, 128>}, {pipeline_mode = #tpu.pipeline_mode<synchronous>, transform_indices = @transform_2, window_bounds = array<i64: 1, 128>}, {pipeline_mode = #tpu.pipeline_mode<synchronous>, transform_indices = @transform_3, window_bounds = array<i64: 1, 128>}, {pipeline_mode = #tpu.pipeline_mode<synchronous>, transform_indices = @transform_4, window_bounds = array<i64: 8, 128>}, {pipeline_mode = #tpu.pipeline_mode<synchronous>, transform_indices = @transform_5, window_bounds = array<i64: 8, 128>}]} {
    %c0_i32 = arith.constant 0 : i32
    %0 = arith.cmpi eq, %arg0, %c0_i32 : i32
    %1 = arith.extui %0 : i1 to i32
    %c0_i32_0 = arith.constant 0 : i32
    %2 = arith.cmpi ne, %1, %c0_i32_0 : i32
    scf.if %2 {
      %cst_9 = arith.constant 0.000000e+00 : f32
      %12 = vector.broadcast %cst_9 : f32 to vector<8x128xf32>
      %c0_10 = arith.constant 0 : index
      %c0_11 = arith.constant 0 : index
      %13 = vector.load %arg7[%c0_10, %c0_11] : memref<8x128xf32, #tpu.memory_space<vmem>>, vector<8x128xf32>
      tpu.vector_store %arg7[%c0_10, %c0_11], %12 {strides = array<i32>} : memref<8x128xf32, #tpu.memory_space<vmem>>, vector<8x128xf32>,
    } else {
    }
    %c0 = arith.constant 0 : index
    %c0_1 = arith.constant 0 : index
    %3 = vector.load %arg7[%c0, %c0_1] : memref<8x128xf32, #tpu.memory_space<vmem>>, vector<8x128xf32>
    %c0_2 = arith.constant 0 : index
    %c0_3 = arith.constant 0 : index
    %4 = vector.load %arg1[%c0_2, %c0_3] : memref<8x256xbf16, #tpu.memory_space<vmem>>, vector<8x256xbf16>
    %c0_4 = arith.constant 0 : index
    %c0_5 = arith.constant 0 : index
    %5 = vector.load %arg2[%c0_4, %c0_5] : memref<256x128xbf16, #tpu.memory_space<vmem>>, vector<256x128xbf16>
    %cst = arith.constant dense<0.000000e+00> : vector<8x128xf32>
    %6 = tpu.matmul %4, %5, %cst {dimension_numbers = #tpu.dot_dimension_numbers<[1], [0], [0], [1], [0, 0, 1, 1], [], []>} : vector<8x256xbf16>, vector<256x128xbf16>, vector<8x128xf32> -> vector<8x128xf32>
    %7 = arith.addf %3, %6 : vector<8x128xf32>
    %c0_6 = arith.constant 0 : index
    %c0_7 = arith.constant 0 : index
    %8 = vector.load %arg7[%c0_6, %c0_7] : memref<8x128xf32, #tpu.memory_space<vmem>>, vector<8x128xf32>
    tpu.vector_store %arg7[%c0_6, %c0_7], %7 {strides = array<i32>} : memref<8x128xf32, #tpu.memory_space<vmem>>, vector<8x128xf32>,
    %c2_i32 = arith.constant 2 : i32
    %9 = arith.cmpi eq, %arg0, %c2_i32 : i32
    %10 = arith.extui %9 : i1 to i32
    %c0_i32_8 = arith.constant 0 : i32
    %11 = arith.cmpi ne, %10, %c0_i32_8 : i32
    scf.if %11 {
      %c0_9 = arith.constant 0 : index
      %c0_10 = arith.constant 0 : index
      %12 = vector.load %arg7[%c0_9, %c0_10] : memref<8x128xf32, #tpu.memory_space<vmem>>, vector<8x128xf32>
      %c0_11 = arith.constant 0 : index
      %c0_12 = arith.constant 0 : index
      %13 = vector.load %arg3[%c0_11, %c0_12] : memref<1x128xf32, #tpu.memory_space<vmem>>, vector<1x128xf32>
      %14 = vector.broadcast %13 : vector<1x128xf32> to vector<8x128xf32>
      %15 = arith.addf %12, %14 : vector<8x128xf32>
      %c0_13 = arith.constant 0 : index
      %c0_14 = arith.constant 0 : index
      %16 = vector.load %arg4[%c0_13, %c0_14] : memref<1x128xf32, #tpu.memory_space<vmem>>, vector<1x128xf32>
      %17 = vector.broadcast %16 : vector<1x128xf32> to vector<8x128xf32>
      %18 = arith.mulf %15, %17 : vector<8x128xf32>
      %c0_15 = arith.constant 0 : index
      %c0_16 = arith.constant 0 : index
      %19 = vector.load %arg5[%c0_15, %c0_16] : memref<8x128xf32, #tpu.memory_space<vmem>>, vector<8x128xf32>
      tpu.vector_store %arg5[%c0_15, %c0_16], %18 {strides = array<i32>} : memref<8x128xf32, #tpu.memory_space<vmem>>, vector<8x128xf32>,
      %20 = tpu.iota {dimensions = array<i32: 1>} : vector<8x128xi32>
      %c0_i32_17 = arith.constant 0 : i32
      %21 = vector.broadcast %c0_i32_17 : i32 to vector<8x128xi32>
      %22 = arith.cmpi sge, %20, %21 : vector<8x128xi32>
      %c16_i32 = arith.constant 16 : i32
      %23 = vector.broadcast %c16_i32 : i32 to vector<8x128xi32>
      %24 = arith.cmpi slt, %20, %23 : vector<8x128xi32>
      %25 = arith.andi %22, %24 : vector<8x128xi1>
      %cst_18 = arith.constant -1.000000e+30 : f32
      %26 = vector.broadcast %cst_18 : f32 to vector<8x128xf32>
      %27 = arith.select %25, %18, %26 : vector<8x128xi1>, vector<8x128xf32>
      %cst_19 = arith.constant dense<0xFF800000> : vector<8xf32>
      %28 = vector.multi_reduction <maximumf>, %27, %cst_19 [1] : vector<8x128xf32> to vector<8xf32>
      %29 = vector.shape_cast %28 : vector<8xf32> to vector<8x1xf32>
      %30 = vector.broadcast %29 : vector<8x1xf32> to vector<8x128xf32>
      %31 = arith.subf %27, %30 : vector<8x128xf32>
      %32 = math.exp %31 : vector<8x128xf32>
      %cst_20 = arith.constant dense<0.000000e+00> : vector<8xf32>
      %33 = vector.multi_reduction <add>, %32, %cst_20 [1] : vector<8x128xf32> to vector<8xf32>
      %34 = vector.shape_cast %33 : vector<8xf32> to vector<8x1xf32>
      %35 = vector.broadcast %34 : vector<8x1xf32> to vector<8x128xf32>
      %36 = arith.divf %32, %35 : vector<8x128xf32>
      %37 = math.log %34 : vector<8x1xf32>
      %38 = vector.broadcast %37 : vector<8x1xf32> to vector<8x128xf32>
      %39 = arith.subf %31, %38 : vector<8x128xf32>
      %cst_21 = arith.constant 0.000000e+00 : f32
      %40 = vector.broadcast %cst_21 : f32 to vector<8x128xf32>
      %41 = arith.select %25, %39, %40 : vector<8x128xi1>, vector<8x128xf32>
      %c16_i32_22 = arith.constant 16 : i32
      %42 = vector.broadcast %c16_i32_22 : i32 to vector<8x128xi32>
      %43 = arith.cmpi sge, %20, %42 : vector<8x128xi32>
      %c32_i32 = arith.constant 32 : i32
      %44 = vector.broadcast %c32_i32 : i32 to vector<8x128xi32>
      %45 = arith.cmpi slt, %20, %44 : vector<8x128xi32>
      %46 = arith.andi %43, %45 : vector<8x128xi1>
      %cst_23 = arith.constant -1.000000e+30 : f32
      %47 = vector.broadcast %cst_23 : f32 to vector<8x128xf32>
      %48 = arith.select %46, %18, %47 : vector<8x128xi1>, vector<8x128xf32>
      %cst_24 = arith.constant dense<0xFF800000> : vector<8xf32>
      %49 = vector.multi_reduction <maximumf>, %48, %cst_24 [1] : vector<8x128xf32> to vector<8xf32>
      %50 = vector.shape_cast %49 : vector<8xf32> to vector<8x1xf32>
      %51 = vector.broadcast %50 : vector<8x1xf32> to vector<8x128xf32>
      %52 = arith.subf %48, %51 : vector<8x128xf32>
      %53 = math.exp %52 : vector<8x128xf32>
      %cst_25 = arith.constant dense<0.000000e+00> : vector<8xf32>
      %54 = vector.multi_reduction <add>, %53, %cst_25 [1] : vector<8x128xf32> to vector<8xf32>
      %55 = vector.shape_cast %54 : vector<8xf32> to vector<8x1xf32>
      %56 = vector.broadcast %55 : vector<8x1xf32> to vector<8x128xf32>
      %57 = arith.divf %53, %56 : vector<8x128xf32>
      %58 = math.log %55 : vector<8x1xf32>
      %59 = vector.broadcast %58 : vector<8x1xf32> to vector<8x128xf32>
      %60 = arith.subf %52, %59 : vector<8x128xf32>
      %cst_26 = arith.constant 0.000000e+00 : f32
      %61 = vector.broadcast %cst_26 : f32 to vector<8x128xf32>
      %62 = arith.select %46, %60, %61 : vector<8x128xi1>, vector<8x128xf32>
      %c32_i32_27 = arith.constant 32 : i32
      %63 = vector.broadcast %c32_i32_27 : i32 to vector<8x128xi32>
      %64 = arith.cmpi sge, %20, %63 : vector<8x128xi32>
      %c48_i32 = arith.constant 48 : i32
      %65 = vector.broadcast %c48_i32 : i32 to vector<8x128xi32>
      %66 = arith.cmpi slt, %20, %65 : vector<8x128xi32>
      %67 = arith.andi %64, %66 : vector<8x128xi1>
      %cst_28 = arith.constant -1.000000e+30 : f32
      %68 = vector.broadcast %cst_28 : f32 to vector<8x128xf32>
      %69 = arith.select %67, %18, %68 : vector<8x128xi1>, vector<8x128xf32>
      %cst_29 = arith.constant dense<0xFF800000> : vector<8xf32>
      %70 = vector.multi_reduction <maximumf>, %69, %cst_29 [1] : vector<8x128xf32> to vector<8xf32>
      %71 = vector.shape_cast %70 : vector<8xf32> to vector<8x1xf32>
      %72 = vector.broadcast %71 : vector<8x1xf32> to vector<8x128xf32>
      %73 = arith.subf %69, %72 : vector<8x128xf32>
      %74 = math.exp %73 : vector<8x128xf32>
      %cst_30 = arith.constant dense<0.000000e+00> : vector<8xf32>
      %75 = vector.multi_reduction <add>, %74, %cst_30 [1] : vector<8x128xf32> to vector<8xf32>
      %76 = vector.shape_cast %75 : vector<8xf32> to vector<8x1xf32>
      %77 = vector.broadcast %76 : vector<8x1xf32> to vector<8x128xf32>
      %78 = arith.divf %74, %77 : vector<8x128xf32>
      %79 = tpu.iota {dimensions = array<i32: 0>} : vector<128x128xi32>
      %80 = tpu.iota {dimensions = array<i32: 1>} : vector<128x128xi32>
      %c16_i32_31 = arith.constant 16 : i32
      %81 = vector.broadcast %c16_i32_31 : i32 to vector<128x128xi32>
      %82 = arith.addi %80, %81 : vector<128x128xi32>
      %83 = arith.cmpi eq, %79, %82 : vector<128x128xi32>
      %84 = arith.extui %83 : vector<128x128xi1> to vector<128x128xi32>
      %85 = arith.sitofp %84 : vector<128x128xi32> to vector<128x128xf32>
      %cst_32 = arith.constant dense<0.000000e+00> : vector<8x128xf32>
      %86 = tpu.matmul %57, %85, %cst_32 {dimension_numbers = #tpu.dot_dimension_numbers<[1], [0], [0], [1], [0, 0, 1, 1], [], []>} : vector<8x128xf32>, vector<128x128xf32>, vector<8x128xf32> -> vector<8x128xf32>
      %cst_33 = arith.constant 2.000000e+00 : f32
      %87 = math.log %cst_33 : f32
      %cst_34 = arith.constant 1.000000e+00 : f32
      %88 = arith.divf %cst_34, %87 : f32
      %cst_35 = arith.constant 2.000000e+02 : f32
      %89 = math.log %cst_35 : f32
      %90 = arith.mulf %89, %88 : f32
      %cst_36 = arith.constant 9.99999974E-6 : f32
      %91 = vector.broadcast %cst_36 : f32 to vector<8x128xf32>
      %92 = arith.addf %57, %91 : vector<8x128xf32>
      %93 = math.log %92 : vector<8x128xf32>
      %94 = vector.broadcast %88 : f32 to vector<8x128xf32>
      %95 = arith.mulf %93, %94 : vector<8x128xf32>
      %96 = arith.mulf %57, %95 : vector<8x128xf32>
      %cst_37 = arith.constant dense<0.000000e+00> : vector<8xf32>
      %97 = vector.multi_reduction <add>, %96, %cst_37 [1] : vector<8x128xf32> to vector<8xf32>
      %98 = vector.shape_cast %97 : vector<8xf32> to vector<8x1xf32>
      %cst_38 = arith.constant 0.000000e+00 : f32
      %99 = vector.broadcast %cst_38 : f32 to vector<8x1xf32>
      %100 = arith.subf %99, %98 : vector<8x1xf32>
      %101 = vector.broadcast %90 : f32 to vector<8x1xf32>
      %102 = arith.divf %100, %101 : vector<8x1xf32>
      %cst_39 = arith.constant 0.000000e+00 : f32
      %103 = vector.broadcast %cst_39 : f32 to vector<8x1xf32>
      %104 = arith.subf %103, %102 : vector<8x1xf32>
      %105 = math.exp %104 : vector<8x1xf32>
      %106 = arith.mulf %86, %41 : vector<8x128xf32>
      %cst_40 = arith.constant dense<0.000000e+00> : vector<8xf32>
      %107 = vector.multi_reduction <add>, %106, %cst_40 [1] : vector<8x128xf32> to vector<8xf32>
      %108 = vector.shape_cast %107 : vector<8xf32> to vector<8x1xf32>
      %cst_41 = arith.constant 0.000000e+00 : f32
      %109 = vector.broadcast %cst_41 : f32 to vector<8x1xf32>
      %110 = arith.subf %109, %108 : vector<8x1xf32>
      %111 = arith.mulf %36, %41 : vector<8x128xf32>
      %cst_42 = arith.constant dense<0.000000e+00> : vector<8xf32>
      %112 = vector.multi_reduction <add>, %111, %cst_42 [1] : vector<8x128xf32> to vector<8xf32>
      %113 = vector.shape_cast %112 : vector<8xf32> to vector<8x1xf32>
      %cst_43 = arith.constant 0.000000e+00 : f32
      %114 = vector.broadcast %cst_43 : f32 to vector<8x1xf32>
      %115 = arith.subf %114, %113 : vector<8x1xf32>
      %116 = arith.mulf %57, %62 : vector<8x128xf32>
      %cst_44 = arith.constant dense<0.000000e+00> : vector<8xf32>
      %117 = vector.multi_reduction <add>, %116, %cst_44 [1] : vector<8x128xf32> to vector<8xf32>
      %118 = vector.shape_cast %117 : vector<8xf32> to vector<8x1xf32>
      %cst_45 = arith.constant 0.000000e+00 : f32
      %119 = vector.broadcast %cst_45 : f32 to vector<8x1xf32>
      %120 = arith.subf %119, %118 : vector<8x1xf32>
      %cst_46 = arith.constant dense<0xFF800000> : vector<8xf32>
      %121 = vector.multi_reduction <maximumf>, %78, %cst_46 [1] : vector<8x128xf32> to vector<8xf32>
      %122 = vector.shape_cast %121 : vector<8xf32> to vector<8x1xf32>
      %123 = tpu.iota {dimensions = array<i32: 1>} : vector<8x128xi32>
      %c0_i32_47 = arith.constant 0 : i32
      %124 = vector.broadcast %c0_i32_47 : i32 to vector<8x128xi32>
      %125 = arith.cmpi eq, %123, %124 : vector<8x128xi32>
      %cst_48 = arith.constant 0.000000e+00 : f32
      %126 = vector.shape_cast %105 : vector<8x1xf32> to vector<8x1xf32>
      %127 = vector.broadcast %126 : vector<8x1xf32> to vector<8x128xf32>
      %128 = vector.broadcast %cst_48 : f32 to vector<8x128xf32>
      %129 = arith.select %125, %127, %128 : vector<8x128xi1>, vector<8x128xf32>
      %c1_i32 = arith.constant 1 : i32
      %130 = vector.broadcast %c1_i32 : i32 to vector<8x128xi32>
      %131 = arith.cmpi eq, %123, %130 : vector<8x128xi32>
      %cst_49 = arith.constant 0.000000e+00 : f32
      %132 = vector.shape_cast %110 : vector<8x1xf32> to vector<8x1xf32>
      %133 = vector.broadcast %132 : vector<8x1xf32> to vector<8x128xf32>
      %134 = vector.broadcast %cst_49 : f32 to vector<8x128xf32>
      %135 = arith.select %131, %133, %134 : vector<8x128xi1>, vector<8x128xf32>
      %136 = arith.addf %129, %135 : vector<8x128xf32>
      %c2_i32_50 = arith.constant 2 : i32
      %137 = vector.broadcast %c2_i32_50 : i32 to vector<8x128xi32>
      %138 = arith.cmpi eq, %123, %137 : vector<8x128xi32>
      %cst_51 = arith.constant 0.000000e+00 : f32
      %139 = vector.shape_cast %115 : vector<8x1xf32> to vector<8x1xf32>
      %140 = vector.broadcast %139 : vector<8x1xf32> to vector<8x128xf32>
      %141 = vector.broadcast %cst_51 : f32 to vector<8x128xf32>
      %142 = arith.select %138, %140, %141 : vector<8x128xi1>, vector<8x128xf32>
      %143 = arith.addf %136, %142 : vector<8x128xf32>
      %c3_i32 = arith.constant 3 : i32
      %144 = vector.broadcast %c3_i32 : i32 to vector<8x128xi32>
      %145 = arith.cmpi eq, %123, %144 : vector<8x128xi32>
      %cst_52 = arith.constant 0.000000e+00 : f32
      %146 = vector.shape_cast %120 : vector<8x1xf32> to vector<8x1xf32>
      %147 = vector.broadcast %146 : vector<8x1xf32> to vector<8x128xf32>
      %148 = vector.broadcast %cst_52 : f32 to vector<8x128xf32>
      %149 = arith.select %145, %147, %148 : vector<8x128xi1>, vector<8x128xf32>
      %150 = arith.addf %143, %149 : vector<8x128xf32>
      %c4_i32 = arith.constant 4 : i32
      %151 = vector.broadcast %c4_i32 : i32 to vector<8x128xi32>
      %152 = arith.cmpi eq, %123, %151 : vector<8x128xi32>
      %cst_53 = arith.constant 0.000000e+00 : f32
      %153 = vector.shape_cast %122 : vector<8x1xf32> to vector<8x1xf32>
      %154 = vector.broadcast %153 : vector<8x1xf32> to vector<8x128xf32>
      %155 = vector.broadcast %cst_53 : f32 to vector<8x128xf32>
      %156 = arith.select %152, %154, %155 : vector<8x128xi1>, vector<8x128xf32>
      %157 = arith.addf %150, %156 : vector<8x128xf32>
      %c0_54 = arith.constant 0 : index
      %c0_55 = arith.constant 0 : index
      %158 = vector.load %arg6[%c0_54, %c0_55] : memref<8x128xf32, #tpu.memory_space<vmem>>, vector<8x128xf32>
      tpu.vector_store %arg6[%c0_54, %c0_55], %157 {strides = array<i32>} : memref<8x128xf32, #tpu.memory_space<vmem>>, vector<8x128xf32>,
    } else {
    }
    return
  }
  func.func @transform_0(%arg0: i32) -> (i32, i32) {
    %c0_i32 = arith.constant 0 : i32
    %c0_i32_0 = arith.constant 0 : i32
    return %c0_i32, %arg0 : i32, i32
  }
  func.func @transform_1(%arg0: i32) -> (i32, i32) {
    %c0_i32 = arith.constant 0 : i32
    %c0_i32_0 = arith.constant 0 : i32
    return %arg0, %c0_i32 : i32, i32
  }
  func.func @transform_2(%arg0: i32) -> (i32, i32) {
    %c0_i32 = arith.constant 0 : i32
    %c0_i32_0 = arith.constant 0 : i32
    %c0_i32_1 = arith.constant 0 : i32
    return %c0_i32, %c0_i32_0 : i32, i32
  }
  func.func @transform_3(%arg0: i32) -> (i32, i32) {
    %c0_i32 = arith.constant 0 : i32
    %c0_i32_0 = arith.constant 0 : i32
    %c0_i32_1 = arith.constant 0 : i32
    return %c0_i32, %c0_i32_0 : i32, i32
  }
  func.func @transform_4(%arg0: i32) -> (i32, i32) {
    %c0_i32 = arith.constant 0 : i32
    %c0_i32_0 = arith.constant 0 : i32
    %c0_i32_1 = arith.constant 0 : i32
    return %c0_i32, %c0_i32_0 : i32, i32
  }
  func.func @transform_5(%arg0: i32) -> (i32, i32) {
    %c0_i32 = arith.constant 0 : i32
    %c0_i32_0 = arith.constant 0 : i32
    %c0_i32_1 = arith.constant 0 : i32
    return %c0_i32, %c0_i32_0 : i32, i32
  }
}

</mosaic_0001>

<bundles_post_ra>
// kernel: tpu_custom_call.1
= control target key start
LH: loop header
LB: loop body
LE: loop exit
PB: predicated region body
PF: predicated region fallthrough
CT: control target
= control target key end

     0   :  { %11 = vsyncpa [#allocation4], 0  ;;  %s1572_s0 = inlined_call_operand.hbm [shape: bf16[8,768], index: 0, kind: input, shape index: {}]   ;;  %s1573_s1 = inlined_call_operand.hbm [shape: bf16[768,128], index: 1, kind: input, shape index: {}]   ;;  %s1574_s2 = inlined_call_operand.vmem [shape: f32[1,128], index: 2, kind: input, shape index: {}]   ;;  %s1575_s3 = inlined_call_operand.vmem [shape: f32[1,128], index: 3, kind: input, shape index: {}]   ;;  %s1576_s4 = inlined_call_operand.hbm [shape: f32[8,128], index: 4, kind: output, shape index: {0}]   ;;  %s1577_s5 = inlined_call_operand.hbm [shape: f32[8,128], index: 5, kind: output, shape index: {1}]  }
   0x1   :  { %13 = vsyncpa [#allocation4 + $0x1], 0 }
   0x2   :  { %14 = vsyncpa [#allocation7], 0 }
   0x3   :  { %16 = vsyncpa [#allocation7 + $0x1], 0 }
   0x4   :  { %17 = vsyncpa [#allocation5], 0 }
   0x5   :  { %18 = vsyncpa [#allocation10], 0  ;;  %s1277_s18 = smov 0   ;;  %s1279_s19 = smov 0  }
   0x6   :  { %s1281_s20 = smov 0   ;;  %s1283_s21 = smov 0  }
   0x7 LB: > { %s1296_s22 = sadd.s32 4294967295, %s1234_s21   ;;  %s1299_s23 = sadd.s32 1, %s1234_s21   ;;  %s1234_s21 = sphi %s1283_s21, %s1590_s21   ;;  %s1230_s20 = sphi %s1281_s20, %s1589_s20   ;;  %s1226_s19 = sphi %s1279_s19, %s1588_s19   ;;  %s1222_s18 = sphi %s1277_s18, %s1587_s18  }
   0x8   : > { %s28_s24 = ssub.s32 %s1234_s21, %s1299_s23  ;;  %s31_s25 = sadd.s32 1, %s1230_s20 }
   0x9   : > { %p29_p0 = scmp.eq.s32.totalorder %s28_s24, 0  ;;  %p38_p1 = scmp.ne.s32.totalorder %s1230_s20, %s1226_s19 }
   0xa   : > { %p39_p2 = scmp.eq.s32.totalorder %s1234_s21, 0  ;;  %p44_p3 = scmp.ne.s32.totalorder %s1226_s19, %s1222_s18 }
   0xb   : > { %s1309_s26 = scalar_select %p29_p0, %s1230_s20, %s31_s25  }
   0xc   : > { %p40_p4 = por %p39_p2, %p38_p1  ;;  %p45_p5 = scmp.eq.s32.totalorder %s1296_s22, 0 }
   0xd   : > { %p992_p6 = scmp.lt.s32.totalorder %s1234_s21, 3  ;;  %s1318_s28 = sand.u32 1, %s1230_s20  }
   0xe   : > { %p1313_p7 = por %p45_p5, %p44_p3  ;;  %s809_s29 = sshll.u32 %s1318_s28, 3 }
   0xf   : > { %s874_s30 = sshll.u32 %s1234_s21, 7  ;;  %s188_s9 = scalar_lea.vmem [#allocation3], %s809_s29 }
  0x10   : > { %s1579_s27 = scalar_select %p1313_p7, 1, 0 }
  0x11   : > { %s1325_s8 = scalar_lea.hbm %s1572_s0, %s874_s30  ;;  %s196_s10 = sshll.u32 %s188_s9, 4  ;;  %s1327_s10 = int_to_ptr.vmem [resolvable:$true] %s196_s10 }
  0x12   : > { %p1329_p8 = pnand %p992_p6, %p40_p4  ;;  %s185_s12 = scalar_lea.sflag [#allocation4], %s1318_s28 }
  0x13   : > { %s1076_s13 = scalar_lea.hbm %s1325_s8, 128  ;;  %s1081_s16 = scalar_lea.hbm %s1572_s0, 384 }
  0x14   : > { %p1077_p11 = scmp.ne.s32.totalorder %s1325_s8, %s1076_s13  ;;  %p1078_p12 = pneg %p1329_p8 }
  0x15   : > { %p1082_p1 = scmp.lt.u32.totalorder %s1325_s8, %s1572_s0  ;;  %p1083_p2 = scmp.lt.u32.totalorder %s1081_s16, %s1076_s13 }
  0x16   : > { %p1079_p13 = pnand %p1078_p12, %p1077_p11  ;;  %p1085_p4 = scmp.lt.u32.totalorder %s1076_s13, %s1325_s8 }
  0x17   : > { %p1084_p3 = por %p1083_p2, %p1082_p1 }
  0x18   : > { %p1080_p0 = pneg %p1079_p13 }
  0x19   : > { %p1086_p5 = por %p1085_p4, %p1084_p3 }
  0x1b   : > { %p1087_p6 = pnand %p1086_p5, %p1080_p0 }
  0x1d   : > { %1090 = shalt.err (!%p1087_p6)
}
  0x1e   : > { %s1091_s24 = scalar_lea.vmem %s1327_s10, 128  ;;  %s1236_s25 = smov [#allocation3]  }
  0x1f   : > { %p1092_p11 = scmp.ne.s32.totalorder %s1327_s10, %s1091_s24  ;;  %s1096_s29 = sshll.u32 %s1236_s25, 4  ;;  %s1097_s29 = int_to_ptr.vmem [resolvable:$false] %s1096_s29 }
  0x20   : > { %s1098_s30 = scalar_lea.vmem %s1097_s29, 256  ;;  %p1099_p10 = scmp.lt.s32.totalorder %s1327_s10, %s1097_s29 }
  0x21   : > { %p1094_p13 = pnand %p1092_p11, %p1078_p12  ;;  %p1100_p1 = scmp.lt.s32.totalorder %s1098_s30, %s1091_s24 }
  0x23   : > { %p1095_p9 = pneg %p1094_p13  ;;  %p1101_p2 = por %p1100_p1, %p1099_p10 }
  0x25   : > { %p1102_p3 = pnand %p1101_p2, %p1095_p9 }
  0x27   : > { %1105 = shalt.err (!%p1102_p3)
}
  0x28   : > { %988 = dma.hbm_to_vmem [thread:$0]  (!%p1329_p8), %s1325_s8, 128, %s1327_s10, %s185_s12  }
  0x29   : > { %p1581_p0 = scmp.lt.s32.totalorder %s1234_s21, 4  ;;  %p1582_p4 = scmp.ge.s32.totalorder %s1234_s21, 1 }
  0x2a   : > { %s812_s7 = sshll.u32 %s1318_s28, 7  ;;  %s875_s9 = sshll.u32 %s1234_s21, 11 }
  0x2b   : > { %p1365_p5 = pnand %p1582_p4, %p1581_p0  ;;  %s1374_s15 = scalar_lea.hbm %s1573_s1, %s875_s9 }
  0x2c   : > { %s207_s16 = scalar_lea.vmem [#allocation6], %s812_s7  ;;  %s204_s8 = scalar_lea.sflag [#allocation7], %s1318_s28 }
  0x2d   : > { %s214_s17 = sshll.u32 %s207_s16, 4  ;;  %s1106_s10 = scalar_lea.hbm %s1374_s15, 2048  ;;  %s1376_s17 = int_to_ptr.vmem [resolvable:$true] %s214_s17 }
  0x2e   : > { %p1107_p9 = scmp.ne.s32.totalorder %s1374_s15, %s1106_s10  ;;  %s1111_s18 = scalar_lea.hbm %s1573_s1, 6144 }
  0x2f   : > { %p1112_p11 = scmp.lt.u32.totalorder %s1374_s15, %s1573_s1  ;;  %p1113_p13 = scmp.lt.u32.totalorder %s1111_s18, %s1106_s10 }
  0x30   : > { %p1109_p10 = pnand %p1107_p9, %p1078_p12  ;;  %p1115_p2 = scmp.lt.u32.totalorder %s1106_s10, %s1374_s15 }
  0x31   : > { %p1114_p1 = por %p1113_p13, %p1112_p11 }
  0x32   : > { %p1110_p6 = pneg %p1109_p10 }
  0x33   : > { %p1116_p3 = por %p1115_p2, %p1114_p1 }
  0x35   : > { %p1117_p0 = pnand %p1116_p3, %p1110_p6 }
  0x37   : > { %1120 = shalt.err (!%p1117_p0)
}
  0x38   : > { %s1121_s29 = scalar_lea.vmem %s1376_s17, 2048  ;;  %s1237_s30 = smov [#allocation6]  }
  0x39   : > { %p1122_p4 = scmp.ne.s32.totalorder %s1376_s17, %s1121_s29  ;;  %s1126_s7 = sshll.u32 %s1237_s30, 4  ;;  %s1127_s7 = int_to_ptr.vmem [resolvable:$false] %s1126_s7 }
  0x3a   : > { %s1128_s9 = scalar_lea.vmem %s1127_s7, 4096  ;;  %p1129_p7 = scmp.lt.s32.totalorder %s1376_s17, %s1127_s7 }
  0x3b   : > { %p1124_p9 = pnand %p1122_p4, %p1078_p12  ;;  %p1130_p11 = scmp.lt.s32.totalorder %s1128_s9, %s1121_s29 }
  0x3d   : > { %p1125_p10 = pneg %p1124_p9  ;;  %p1131_p13 = por %p1130_p11, %p1129_p7 }
  0x3f   : > { %p1132_p1 = pnand %p1131_p13, %p1125_p10 }
  0x41   : > { %1135 = shalt.err (!%p1132_p1)
}
  0x42   : > { %s1238_s13 = smov 64   ;;  %s1239_s14 = smov 4  }
  0x43   : > { %991 = dma.hbm_to_vmem [thread:$0]  (!%p1329_p8), %s1374_s15, 2048, %s1376_s17, %s204_s8, %s1238_s13, %s1238_s13, %s1239_s14  }
  0x44   : > { %226 = sbr.rel (%p1365_p5) target bundleno = 1079 (0x437), region = 36  ;;  %s228_s16 = sand.u32 (!%p1365_p5), 1, %s1226_s19  }
  0x45   : > { %s816_s10 = sshll.u32 (!%p1365_p5), %s228_s16, 3  ;;  %s229_s21 = scalar_lea.sflag (!%p1365_p5), [#allocation4], %s228_s16 }
  0x46   : > { %s1407_s12 = scalar_lea.vmem (!%p1365_p5), [#allocation3], %s816_s10  ;;  %p1584_p7 = scmp.ne.s32.totalorder (!%p1365_p5), %s1579_s27, 0 }
  0x4b   : > { %1205 = dma.done.wait (%p1584_p7), %s229_s21, 128  }
  0x4c   : > { %1207 = vsyncadd (%p1584_p7), %s229_s21, 4294967168  ;;  %s817_s18 = sshll.u32 %s228_s16, 7  ;;  %s238_s11 = scalar_lea.sflag [#allocation7], %s228_s16 }
  0x4d   : > { %s1413_s28 = scalar_lea.vmem [#allocation6], %s817_s18 }
  0x4e   : > { %1209 = dma.done.wait (%p1584_p7), %s238_s11, 2048  }
  0x4f   : > { %1211 = vsyncadd (%p1584_p7), %s238_s11, 4294965248  ;;  %p818_p8 = scmp.ne.s32.totalorder %s1296_s22, 0 }
  0x50   : > { %v1240_v0 = vmov (!%p818_p8), 0.0  }
  0x51   : > { %274 = sbr.rel (%p818_p8) target bundleno = 88 (0x58), region = 48  ;;  %275 = vst [vmem:[#allocation2] sm:$0xff] (!%p818_p8), %v1240_v0 }
  0x58 PF: > { %v1038_v1 = vld [vmem:[%s1413_s28 + $0x40] sm:$0xff]   ;;  %v1040_v3 = vld [vmem:[%s1413_s28 + $0x48] sm:$0xff]   ;;  %v1042_v5 = vld [vmem:[%s1413_s28 + $0x50] sm:$0xff]   ;;  %p837_p12 = scmp.ne.s32.totalorder %s1296_s22, 2 }
  0x59   : > { %v1039_v2 = vld [vmem:[%s1413_s28] sm:$0xff]   ;;  %876 = vmatprep.subr.bf16.mxu0 %v1038_v1  ;;  %v1041_v4 = vld [vmem:[%s1413_s28 + $0x8] sm:$0xff]   ;;  %v1043_v6 = vld [vmem:[%s1413_s28 + $0x10] sm:$0xff]   ;;  %v477_v30 = vlaneseq (!%p837_p12)  ;;  %v1241_v42 = vmov (!%p837_p12), 0.0|0.0   ;;  %v1242_v47 = vmov (!%p837_p12), 1.0|1.0  }
  0x5a   : > { %877 = vmatpush3.bf16.msra.mxu0 %v1039_v2  ;;  %v1044_v7 = vld [vmem:[%s1413_s28 + $0x58] sm:$0xff]   ;;  %v1046_v9 = vld [vmem:[%s1413_s28 + $0x60] sm:$0xff]   ;;  %v1048_v11 = vld [vmem:[%s1413_s28 + $0x68] sm:$0xff]  }
  0x5b   : > { %878 = vmatprep.subr.bf16.mxu0 %v1040_v3  ;;  %v1045_v8 = vld [vmem:[%s1413_s28 + $0x18] sm:$0xff]   ;;  %v1047_v10 = vld [vmem:[%s1413_s28 + $0x20] sm:$0xff]   ;;  %v1049_v14 = vld [vmem:[%s1413_s28 + $0x28] sm:$0xff]   ;;  %v1444_v32 = vand.u32 (!%p837_p12), 127, %v477_v30  ;;  %v1459_v38 = vshrl.u32 (!%p837_p12), %v477_v30, 7 }
  0x5c   : > { %v277_v12 = vld [vmem:[%s1407_s12] sm:$0xff]  ;;  %v276_v21 = vld [vmem:[#allocation2] sm:$0xff] }
  0x5d   : > { %v820_v13 = vcombine.high %v277_v12, %v277_v12  ;;  %v1050_v15 = vld [vmem:[%s1413_s28 + $0x70] sm:$0xff]   ;;  %v1052_v17 = vld [vmem:[%s1413_s28 + $0x78] sm:$0xff]   ;;  %v819_v19 = vcombine.low %v277_v12, %v277_v12  ;;  %v838_v28 = vld [vmem:[%s1574_s2] ss:$0 sm:$0xff] (!%p837_p12)  ;;  %vm496_vm0 = vcmp.ge.s32.totalorder (!%p837_p12), %v1444_v32, 16  ;;  %vm497_vm1 = vcmp.lt.s32.totalorder (!%p837_p12), %v1444_v32, 32 }
  0x5e   : > { %879 = vmatpush3.bf16.msra.mxu0 %v1041_v4  ;;  %v1051_v16 = vld [vmem:[%s1413_s28 + $0x30] sm:$0xff]   ;;  %v1053_v18 = vld [vmem:[%s1413_s28 + $0x38] sm:$0xff]   ;;  %v839_v29 = vld [vmem:[%s1575_s3] ss:$0 sm:$0xff] (!%p837_p12)  ;;  %vm480_vm2 = vcmp.lt.s32.totalorder (!%p837_p12), %v1444_v32, 16  ;;  %vm513_vm3 = vcmp.ge.s32.totalorder (!%p837_p12), %v1444_v32, 32 }
  0x5f   : > { %880 = vmatprep.subr.bf16.mxu0 %v1042_v5  ;;  %445 = vmatprep.mubr.bf16.mxu0 %v820_v13  ;;  %vm1450_vm4 = vmand (!%p837_p12), %vm496_vm0, %vm497_vm1  ;;  %vm514_vm5 = vcmp.lt.s32.totalorder (!%p837_p12), %v1444_v32, 48  ;;  %v529_v39 = vadd.s32 (!%p837_p12), 16, %v1459_v38  ;;  %v530_v40 = vadd.s32 (!%p837_p12), 24, %v1459_v38  ;;  %v1464_v41 = vadd.s32 (!%p837_p12), 16, %v1444_v32 }
  0x60   : > { %vm515_vm6 = vmand (!%p837_p12), %vm513_vm3, %vm514_vm5  ;;  %v531_v43 = vadd.s32 (!%p837_p12), 32, %v1459_v38  ;;  %v532_v44 = vadd.s32 (!%p837_p12), 40, %v1459_v38  ;;  %v533_v45 = vadd.s32 (!%p837_p12), 48, %v1459_v38  ;;  %v534_v46 = vadd.s32 (!%p837_p12), 56, %v1459_v38 }
  0x61   : > { %vm546_vm7 = vcmp.eq.s32.totalorder (!%p837_p12), %v529_v39, %v1464_v41  ;;  %vm547_vm8 = vcmp.eq.s32.totalorder (!%p837_p12), %v530_v40, %v1464_v41  ;;  %v535_v48 = vadd.s32 (!%p837_p12), 64, %v1459_v38  ;;  %v536_v49 = vadd.s32 (!%p837_p12), 72, %v1459_v38 }
  0x62   : > { %881 = vmatpush3.bf16.msra.mxu0 %v1043_v6  ;;  %vm953_vm9 = vmpackc.low (!%p837_p12), %vm547_vm8, %vm546_vm7  ;;  %vm548_vm10 = vcmp.eq.s32.totalorder (!%p837_p12), %v531_v43, %v1464_v41  ;;  %vm549_vm11 = vcmp.eq.s32.totalorder (!%p837_p12), %v532_v44, %v1464_v41  ;;  %vm550_vm13 = vcmp.eq.s32.totalorder (!%p837_p12), %v533_v45, %v1464_v41  ;;  %vm551_vm14 = vcmp.eq.s32.totalorder (!%p837_p12), %v534_v46, %v1464_v41 }
  0x63   : > { %882 = vmatprep.subr.bf16.mxu0 %v1044_v7  ;;  %vm956_vm12 = vmpackc.low (!%p837_p12), %vm549_vm11, %vm548_vm10  ;;  %vm552_vm0 = vcmp.eq.s32.totalorder (!%p837_p12), %v535_v48, %v1464_v41  ;;  %vm553_vm1 = vcmp.eq.s32.totalorder (!%p837_p12), %v536_v49, %v1464_v41  ;;  %v537_v62 = vadd.s32 (!%p837_p12), 80, %v1459_v38  ;;  %v538_v63 = vadd.s32 (!%p837_p12), 88, %v1459_v38 }
  0x64   : > { %vm959_vm15 = vmpackc.low (!%p837_p12), %vm551_vm14, %vm550_vm13  ;;  %v539_v0 = vadd.s32 (!%p837_p12), 96, %v1459_v38  ;;  %v540_v1 = vadd.s32 (!%p837_p12), 104, %v1459_v38  ;;  %v541_v2 = vadd.s32 (!%p837_p12), 112, %v1459_v38  ;;  %v542_v3 = vadd.s32 (!%p837_p12), 120, %v1459_v38 }
  0x65   : > { %vm962_vm3 = vmpackc.low (!%p837_p12), %vm553_vm1, %vm552_vm0  ;;  %vm554_vm5 = vcmp.eq.s32.totalorder (!%p837_p12), %v537_v62, %v1464_v41  ;;  %vm1243_vm14 = vmmov (!%p837_p12), 0   ;;  %v1244_v4 = vmov (!%p837_p12), 0.0   ;;  %vm697_vm0 = vcmp.eq.s32.totalorder (!%p837_p12), %v1444_v32, 3 }
  0x66   : > { %883 = vmatpush3.bf16.msra.mxu0 %v1045_v8  ;;  %vm556_vm8 = vcmp.eq.s32.totalorder (!%p837_p12), %v539_v0, %v1464_v41  ;;  %vm558_vm11 = vcmp.eq.s32.totalorder (!%p837_p12), %v541_v2, %v1464_v41  ;;  %vm700_vm1 = vcmp.eq.s32.totalorder (!%p837_p12), %v1444_v32, 4 }
  0x67   : > { %884 = vmatprep.subr.bf16.mxu0 %v1046_v9 }
  0x6a   : > { %885 = vmatpush3.bf16.msra.mxu0 %v1047_v10 }
  0x6b   : > { %886 = vmatprep.subr.bf16.mxu0 %v1048_v11 }
  0x6e   : > { %887 = vmatpush3.bf16.msra.mxu0 %v1049_v14 }
  0x6f   : > { %888 = vmatprep.subr.bf16.mxu0 %v1050_v15 }
  0x72   : > { %889 = vmatpush3.bf16.msra.mxu0 %v1051_v16 }
  0x73   : > { %890 = vmatprep.subr.bf16.mxu0 %v1052_v17 }
  0x76   : > { %891 = vmatpush3.bf16.msra.mxu0 %v1053_v18 }
  0x77   : > { %950 = vmatprep.subr.bf16.mxu0 (!%p837_p12), %v1241_v42 }
  0x79   : > { %446 = vmatmul.mubr.bf16.vlgmr.msra.gmra.mrb[0].mxu0 %v819_v19 }
  0x7a   : > { %951 = vmatpush3.bf16.msra.mxu0 (!%p837_p12), %v1241_v42  ;;  %947 = vmatprep.mubr.msk.f32.mxu0 (!%p837_p12), %vm1243_vm14, %v1244_v4 }
  0x7b   : > { %952 = vmatprep.subr.bf16.mxu0 (!%p837_p12), %v1241_v42 }
  0x7e   : > { %954 = vmatpush3.bf16.msk.msra.mxu0 (!%p837_p12), %vm953_vm9, %v1242_v47  ;;  %vm557_vm9 = vcmp.eq.s32.totalorder (!%p837_p12), %v540_v1, %v1464_v41 }
  0x7f   : > { %955 = vmatprep.subr.bf16.mxu0 (!%p837_p12), %v1241_v42  ;;  %vm968_vm10 = vmpackc.low (!%p837_p12), %vm557_vm9, %vm556_vm8 }
  0x82   : > { %957 = vmatpush3.bf16.msk.msra.mxu0 (!%p837_p12), %vm956_vm12, %v1242_v47  ;;  %vm559_vm12 = vcmp.eq.s32.totalorder (!%p837_p12), %v542_v3, %v1464_v41 }
  0x83   : > { %958 = vmatprep.subr.bf16.mxu0 (!%p837_p12), %v1241_v42  ;;  %vm971_vm13 = vmpackc.low (!%p837_p12), %vm559_vm12, %vm558_vm11 }
  0x86   : > { %960 = vmatpush3.bf16.msk.msra.mxu0 (!%p837_p12), %vm959_vm15, %v1242_v47  ;;  %vm694_vm15 = vcmp.eq.s32.totalorder (!%p837_p12), %v1444_v32, 2 }
  0x87   : > { %961 = vmatprep.subr.bf16.mxu0 (!%p837_p12), %v1241_v42 }
  0x8a   : > { %963 = vmatpush3.bf16.msk.msra.mxu0 (!%p837_p12), %vm962_vm3, %v1242_v47 }
  0x8b   : > { %964 = vmatprep.subr.bf16.mxu0 (!%p837_p12), %v1241_v42 }
 0x14c   : > { %v892_v20 = vpop.f32.mrb[0].mxu0  ;;  %458 = sbr.rel (%p837_p12) target bundleno = 1031 (0x407), region = 52 }
 0x14d   : > { %v893_v22 = vpop.f32.mrb[1].mxu0 }
 0x14e   : > { %v894_v23 = vadd.f32 %v893_v22, %v892_v20  ;;  %v895_v24 = vpop.f32.mrb[2].mxu0 }
 0x14f   : > { %v896_v25 = vpop.f32.mrb[3].mxu0 }
 0x150   : > { %v453_v26 = vadd.f32 %v894_v23, %v276_v21 }
 0x152   : > { %454 = vst [vmem:[#allocation2] sm:$0xff] %v453_v26 }
 0x159   : > { %v459_v27 = vld [vmem:[#allocation2] sm:$0xff] }
 0x15a   : > { %v467_v31 = vadd.f32 %v838_v28, %v459_v27 }
 0x15c   : > { %v475_v33 = vmul.f32 %v839_v29, %v467_v31 }
 0x15e   : > { %476 = vst [vmem:[#allocation8] sm:$0xff] %v475_v33  ;;  %v482_v35 = vsel %vm480_vm2, %v475_v33, -1e+30  ;;  %v499_v36 = vsel %vm1450_vm4, %v475_v33, -1e+30 }
 0x15f   : > { %483 = vmax.xlane.f32.xlu1 %v482_v35  ;;  %500 = vmax.xlane.f32.xlu0 %v499_v36  ;;  %v516_v37 = vsel %vm515_vm6, %v475_v33, -1e+30  ;;  %vm555_vm6 = vcmp.eq.s32.totalorder %v538_v63, %v1464_v41 }
 0x160   : > { %vm965_vm7 = vmpackc.low %vm555_vm6, %vm554_vm5 }
 0x161   : > { %966 = vmatpush3.bf16.msk.msra.mxu0 %vm965_vm7, %v1242_v47 }
 0x162   : > { %967 = vmatprep.subr.bf16.mxu0 %v1241_v42 }
 0x163   : > { %517 = vmax.xlane.f32.xlu1 %v516_v37 }
 0x165   : > { %969 = vmatpush3.bf16.msk.msra.mxu0 %vm968_vm10, %v1242_v47 }
 0x166   : > { %970 = vmatprep.subr.bf16.mxu0 %v1241_v42 }
 0x169   : > { %972 = vmatpush3.bf16.msk.msra.mxu0 %vm971_vm13, %v1242_v47 }
 0x1ec   : > { %v484_v50 = vpop.xlane.xlu1 %483  ;;  %v501_v51 = vpop.xlane.xlu0 %500 }
 0x1ed   : > { %v1487_v52 = vsub.f32 %v482_v35, %v484_v50  ;;  %v502_v53 = vsub.f32 %v499_v36, %v501_v51 }
 0x1ef   : > { %v503_v54 = vmul.f32 1.442695, %v502_v53  ;;  %v486_v55 = vmul.f32 1.442695, %v1487_v52 }
 0x1f0   : > { %v518_v56 = vpop.xlane.xlu1 %517 }
 0x1f1   : > { %v519_v57 = vsub.f32 %v516_v37, %v518_v56  ;;  %1056 = vpow2.f32 %v503_v54 }
 0x1f2   : > { %1058 = vpow2.f32 %v486_v55 }
 0x1f3   : > { %v520_v58 = vmul.f32 1.442695, %v519_v57 }
 0x1f5   : > { %1060 = vpow2.f32 %v520_v58 }
 0x1fb   : > { %v1057_v59 = vpop.eup %1056 }
 0x1fc   : > { %505 = vadd.xlane.f32.xlu0 %v1057_v59  ;;  %v1059_v60 = vpop.eup %1058 }
 0x1ff   : > { %v1061_v61 = vpop.eup %1060 }
 0x200   : > { %522 = vadd.xlane.f32.xlu1 %v1061_v61  ;;  %488 = vadd.xlane.f32.xlu0 %v1059_v60 }
 0x289   : > { %v506_v5 = vpop.xlane.xlu0 %505 }
 0x28a   : > { %1062 = vrcp.f32 %v506_v5 }
 0x28b   : > { %1064 = vlog2.f32 %v506_v5 }
 0x28d   : > { %v489_v6 = vpop.xlane.xlu0 %488  ;;  %v523_v16 = vpop.xlane.xlu1 %522 }
 0x28e   : > { %1066 = vlog2.f32 %v489_v6 }
 0x28f   : > { %1068 = vrcp.f32 %v489_v6 }
 0x294   : > { %v1063_v7 = vpop.eup %1062 }
 0x295   : > { %v1065_v8 = vpop.eup %1064  ;;  %v508_v9 = vmul.f32 %v1063_v7, %v1057_v59 }
 0x296   : > { %v510_v10 = vmul.f32 0.6931472, %v1065_v8 }
 0x297   : > { %948 = vmatmul.mubr.f32.vlgmr.msra.gmra.mrb[0].mxu0 %v508_v9  ;;  %v662_v11 = vadd.f32 1e-05, %v508_v9 }
 0x298   : > { %v511_v12 = vsub.f32 %v502_v53, %v510_v10  ;;  %v1067_v15 = vpop.eup %1066 }
 0x299   : > { %1070 = vlog2.f32 %v662_v11  ;;  %v493_v17 = vmul.f32 0.6931472, %v1067_v15  ;;  %v1069_v18 = vpop.eup %1068 }
 0x29a   : > { %v512_v13 = vsel %vm1450_vm4, %v511_v12, 0.0  ;;  %1072 = vrcp.f32 %v523_v16  ;;  %v491_v23 = vmul.f32 %v1069_v18, %v1059_v60  ;;  %vm691_vm4 = vcmp.eq.s32.totalorder %v1444_v32, 1 }
 0x29b   : > { %v683_v14 = vmul.f32 %v512_v13, %v508_v9  ;;  %v494_v20 = vsub.f32 %v1487_v52, %v493_v17 }
 0x29d   : > { %v495_v24 = vsel %vm480_vm2, %v494_v20, 0.0  ;;  %vm689_vm2 = vcmp.eq.s32.totalorder %v1444_v32, 0 }
 0x29e   : > { %v679_v26 = vmul.f32 %v495_v24, %v491_v23 }
 0x2a3   : > { %v1071_v19 = vpop.eup %1070 }
 0x2a4   : > { %v664_v21 = vmul.f32 0.6931472, %v1071_v19  ;;  %v1073_v27 = vpop.eup %1072 }
 0x2a5   : > { %v525_v28 = vmul.f32 %v1073_v27, %v1061_v61 }
 0x2a6   : > { %v665_v22 = vmul.f32 1.442695, %v664_v21 }
 0x2a8   : > { %v666_v25 = vmul.f32 %v665_v22, %v508_v9 }
 0x2aa   : > { %667 = vadd.xlane.f32.xlu0 %v666_v25 }
 0x2ae   : > { %680 = vadd.xlane.f32.xlu0 %v679_v26 }
 0x2b2   : > { %687 = vmax.xlane.f32.xlu0 %v525_v28 }
 0x337   : > { %v668_v33 = vpop.xlane.xlu0 %667 }
 0x338   : > { %v669_v34 = vsub.f32 0.0, %v668_v33 }
 0x33a   : > { %v671_v35 = vmul.f32 0.13082403, %v669_v34 }
 0x33b   : > { %v681_v38 = vpop.xlane.xlu0 %680 }
 0x33c   : > { %v672_v36 = vsub.f32 0.0, %v671_v35  ;;  %v682_v41 = vsub.f32 0.0, %v681_v38 }
 0x33e   : > { %v673_v37 = vmul.f32 1.442695, %v672_v36  ;;  %v695_v47 = vsel %vm694_vm15, %v682_v41, 0.0 }
 0x33f   : > { %v688_v49 = vpop.xlane.xlu0 %687 }
 0x340   : > { %1074 = vpow2.f32 %v673_v37  ;;  %v701_v53 = vsel %vm700_vm1, %v688_v49, 0.0 }
 0x34a   : > { %v1075_v39 = vpop.eup %1074 }
 0x34b   : > { %v690_v43 = vsel %vm689_vm2, %v1075_v39, 0.0 }
 0x36a   : > { %v658_v29 = vpop.f32.mrb[0].mxu0 }
 0x36b   : > { %v675_v30 = vmul.f32 %v658_v29, %v495_v24  ;;  %v949_v31 = vpop.f32.mrb[1].mxu0 }
 0x36d   : > { %676 = vadd.xlane.f32.xlu1 %v675_v30 }
 0x371   : > { %684 = vadd.xlane.f32.xlu1 %v683_v14 }
 0x3fa   : > { %v677_v40 = vpop.xlane.xlu1 %676 }
 0x3fb   : > { %v678_v42 = vsub.f32 0.0, %v677_v40 }
 0x3fd   : > { %v692_v44 = vsel %vm691_vm4, %v678_v42, 0.0 }
 0x3fe   : > { %v693_v45 = vadd.f32 %v692_v44, %v690_v43  ;;  %v685_v46 = vpop.xlane.xlu1 %684 }
 0x3ff   : > { %v686_v48 = vsub.f32 0.0, %v685_v46 }
 0x400   : > { %v696_v50 = vadd.f32 %v695_v47, %v693_v45 }
 0x401   : > { %v698_v51 = vsel %vm697_vm0, %v686_v48, 0.0 }
 0x402   : > { %v699_v52 = vadd.f32 %v698_v51, %v696_v50 }
 0x404   : > { %v702_v54 = vadd.f32 %v701_v53, %v699_v52 }
 0x406   : > { %703 = vst [vmem:[#allocation9] sm:$0xff] %v702_v54 }
 0x407 PF: > { %p993_p5 = scmp.eq.s32.totalorder %s1296_s22, 2  ;;  %s1245_s8 = smov [#allocation8]  }
 0x408   : > { %s711_s24 = sshll.u32 %s1245_s8, 4  ;;  %s1246_s25 = smov [#allocation9]   ;;  %s712_s24 = int_to_ptr.vmem [resolvable:$true] %s711_s24 }
 0x409   : > { %s722_s29 = sshll.u32 %s1246_s25, 4  ;;  %s1136_s30 = scalar_lea.vmem %s712_s24, 128  ;;  %s723_s29 = int_to_ptr.vmem [resolvable:$true] %s722_s29 }
 0x40a   : > { %p1137_p6 = scmp.ne.s32.totalorder %s712_s24, %s1136_s30  ;;  %p1143_p0 = scmp.lt.s32.totalorder %s712_s24, %s712_s24 }
 0x40b   : > { %p1144_p4 = scmp.lt.s32.totalorder %s1136_s30, %s1136_s30 }
 0x40c   : > { %p1138_p2 = pnand %p1137_p6, %p993_p5 }
 0x40d   : > { %p1145_p9 = por %p1144_p4, %p1143_p0 }
 0x40e   : > { %p1139_p3 = pneg %p1138_p2 }
 0x410   : > { %p1146_p10 = pnand %p1145_p9, %p1139_p3 }
 0x412   : > { %1149 = shalt.err (!%p1146_p10)
}
 0x413   : > { %s1150_s13 = scalar_lea.hbm %s1576_s4, 128 }
 0x414   : > { %p1151_p11 = scmp.ne.s32.totalorder %s1576_s4, %s1150_s13  ;;  %p1156_p7 = scmp.lt.u32.totalorder %s1150_s13, %s1576_s4 }
 0x416   : > { %p1152_p13 = pnand %p1151_p11, %p993_p5 }
 0x418   : > { %p1153_p1 = pneg %p1152_p13 }
 0x41a   : > { %p1158_p8 = pnand %p1156_p7, %p1153_p1 }
 0x41c   : > { %1161 = shalt.err (!%p1158_p8)
}
 0x41d   : > { %978 = dma.vmem_to_hbm [thread:$0]  (%p993_p5), %s712_s24, 128, %s1576_s4, [#allocation5]  }
 0x41e   : > { %s1162_s11 = scalar_lea.vmem %s723_s29, 128  ;;  %p1169_p3 = scmp.lt.s32.totalorder %s723_s29, %s723_s29 }
 0x41f   : > { %p1163_p12 = scmp.ne.s32.totalorder %s723_s29, %s1162_s11  ;;  %p1170_p0 = scmp.lt.s32.totalorder %s1162_s11, %s1162_s11 }
 0x421   : > { %p1164_p6 = pnand %p1163_p12, %p993_p5  ;;  %p1171_p4 = por %p1170_p0, %p1169_p3 }
 0x423   : > { %p1165_p2 = pneg %p1164_p6 }
 0x425   : > { %p1172_p9 = pnand %p1171_p4, %p1165_p2 }
 0x427   : > { %1175 = shalt.err (!%p1172_p9)
}
 0x428   : > { %s1176_s6 = scalar_lea.hbm %s1577_s5, 128 }
 0x429   : > { %p1177_p10 = scmp.ne.s32.totalorder %s1577_s5, %s1176_s6  ;;  %p1182_p1 = scmp.lt.u32.totalorder %s1176_s6, %s1577_s5 }
 0x42b   : > { %p1178_p11 = pnand %p1177_p10, %p993_p5 }
 0x42d   : > { %p1179_p13 = pneg %p1178_p11 }
 0x42f   : > { %p1184_p7 = pnand %p1182_p1, %p1179_p13 }
 0x431   : > { %1187 = shalt.err (!%p1184_p7)
}
 0x432   : > { %980 = dma.vmem_to_hbm [thread:$0]  (%p993_p5), %s723_s29, 128, %s1577_s5, [#allocation10]  }
 0x433   : > { %1213 = dma.done.wait (%p993_p5), [#allocation5], 128  }
 0x434   : > { %1215 = vsyncadd (%p993_p5), [#allocation5], 4294967168 }
 0x435   : > { %1217 = dma.done.wait (%p993_p5), [#allocation10], 128  }
 0x436   : > { %1219 = vsyncadd (%p993_p5), [#allocation10], 4294967168 }
 0x437 PF: > { %p21_p8 = scmp.ge.s32.totalorder %s1299_s23, 5   ;;  %s1587_s18 = smov %s1226_s19 }
 0x438   : > { %s1588_s19 = smov %s1230_s20  ;;  %s1589_s20 = smov %s1309_s26 }
 0x439   : > { %s1590_s21 = smov %s1299_s23  ;;  %23 = sbr.rel (!%p21_p8) target bundleno = 7 (0x7), region = 102 }
 0x440   :  { %739 = vsyncpa [#allocation4], 1 }
 0x441   :  { %741 = vsyncpa [#allocation4 + $0x1], 1 }
 0x442   :  { %742 = vsyncpa [#allocation7], 1 }
 0x443   :  { %744 = vsyncpa [#allocation7 + $0x1], 1 }
 0x444   :  { %745 = vsyncpa [#allocation5], 1 }
 0x445   :  { %747 = vsyncpa [#allocation5 + $0x1], 1 }
 0x446   :  { %748 = vsyncpa [#allocation10], 1 }

</bundles_post_ra>
